<compile_context>
chip_gen: v5e
topology: v5e:2x2
jax: 0.10.0
libtpu: 0.0.40
codegen_flags: <defaults>
</compile_context>

<pallas_src>
import numpy as np
import jax
import jax.numpy as jnp
from jax.experimental import pallas as pl
from jax.experimental.pallas import tpu as pltpu

BN_EPS = 1e-5
LEAKY_SLOPE = 0.1


# ----------------------- polyphase structure (static) ---------------------- #

def _conv_structure(p_out, p_in, stride):
    """Phase-coupling 0/1 matrices for Conv1d(k=3, stride, padding=1).

    s[t, k, r, d] == 1  <=>  tap t maps input phase d to output phase r with
    lane-shift kind k (0: same q, 1: q-1 zero padded, 2: q+1 zero padded).
    """
    s = np.zeros((3, 3, p_out, p_in), np.float32)
    for r in range(p_out):
        for t in range(3):
            d = stride * r + t - 1
            if d == -1:
                s[t, 1, r, p_in - 1] = 1.0
            elif d == p_in:
                s[t, 2, r, 0] = 1.0
            else:
                s[t, 0, r, d] = 1.0
    return s


def _convt_structure(p_out, p_in):
    """Same for ConvTranspose1d(k=4, stride=2, padding=1); p_out == 2*p_in."""
    s = np.zeros((4, 3, p_out, p_in), np.float32)
    for r in range(p_out):
        for t in range(4):
            e = r + 1 - t
            if e % 2:
                continue
            d = e // 2
            if d == -1:
                s[t, 1, r, p_in - 1] = 1.0
            elif d == p_in:
                s[t, 2, r, 0] = 1.0
            elif 0 <= d < p_in:
                s[t, 0, r, d] = 1.0
    return s


_LAYER_DEFS = (
    # (name,  kind,        p_out, p_in, streams)
    ('down1', ('conv', 2), 4, 8, 1),
    ('down2', ('conv', 2), 2, 4, 1),
    ('conv2', ('conv', 1), 2, 2, 1),
    ('down3', ('conv', 2), 1, 2, 1),
    ('conv3', ('conv', 1), 1, 1, 1),
    ('up1',   'convt',     2, 1, 1),
    ('up2',   'convt',     4, 2, 2),
    ('up3',   'convt',     8, 4, 2),
    ('out',   ('conv', 1), 8, 8, 2),
)


# --------------------------- host-side param prep -------------------------- #

def prepare_params(params, ch, n, q):
    """Fold BN, build per-layer block matrices, pack into 2 slabs + static meta."""
    nq = n * q

    def kron(struct, tap):                       # struct: static numpy (Po, Pi)
        po, pi = struct.shape
        co, ci = tap.shape
        m = jnp.asarray(struct)[:, None, :, None] * tap[None, :, None, :]
        return m.reshape(po * co, pi * ci)       # row r*co+i, col d*ci+j

    slot_r = 8 * ch                              # max rows/cols over all blocks
    slot_c = 8 * ch                              # (multiple of 8 by construction)

    mats, biases, meta = [], [], []
    for name, kind, p_out, p_in, n_streams in _LAYER_DEFS:
        p = params[name]
        if name == 'out':                        # plain conv, bias, no BN, no act
            taps = [p['w'][:, :, t] for t in range(3)]
            bias_c = p['bias']
            struct = _conv_structure(p_out, p_in, 1)
        elif kind == 'convt':                    # ConvTranspose1d + bias + LReLU
            taps = [p['w'][:, :, t].T for t in range(4)]
            bias_c = p['bias']
            struct = _convt_structure(p_out, p_in)
        else:                                    # Conv1d (no bias) + folded BN
            scale = p['g'] / jnp.sqrt(p['v'] + BN_EPS)
            taps = [p['w'][:, :, t] * scale[:, None] for t in range(3)]
            bias_c = p['b'] - p['m'] * scale
            struct = _conv_structure(p_out, p_in, kind[1])

        rows = p_out * ch
        terms = []
        for s in range(n_streams):
            # skip-concat handled by host-side weight (column) splitting
            taps_s = ([t_[:, s * ch:(s + 1) * ch] for t_ in taps]
                      if n_streams > 1 else taps)
            for k in range(3):                   # 0: same q, 1: q-1, 2: q+1
                if not np.any(struct[:, k]):
                    continue
                blk = None
                for t in range(len(taps)):
                    if not np.any(struct[t, k]):
                        continue
                    term = kron(struct[t, k], taps_s[t])
                    blk = term if blk is None else blk + term
                terms.append((s, k, len(mats), p_in * ch))
                mats.append(blk)
        biases.append(jnp.tile(bias_c, p_out))   # row r*ch + c  <-  bias_c[c]
        meta.append(dict(rows=rows, act=(name != 'out'), terms=tuple(terms)))

    # One weight slab: each matrix in its own 8-aligned row slot, cols from 0.
    wpack = jnp.concatenate(
        [jnp.pad(m, ((0, slot_r - m.shape[0]), (0, slot_c - m.shape[1])))
         for m in mats], axis=0)
    # One bias slab, pre-broadcast over the N*Q lane axis (no in-kernel bcast).
    bpack = jnp.concatenate(
        [jnp.pad(jnp.broadcast_to(b[:, None], (b.shape[0], nq)),
                 ((0, slot_r - b.shape[0]), (0, 0)))
         for b in biases], axis=0)

    return wpack, bpack, dict(slot_r=slot_r, meta=tuple(meta))


# ------------------------------ Pallas kernel ------------------------------ #

def _make_kernel(n, q, static):
    slot_r = static['slot_r']
    meta = static['meta']

    def kernel(x_ref, w_ref, b_ref, o_ref):
        """x_ref: (8C, N*Q) phase-major input slab; w_ref: packed block weights;
        b_ref: packed pre-broadcast biases; o_ref: (8C, N*Q) output slab."""

        # q -> q-1 / q+1 neighbours (zero padded at the sequence ends); a lane
        # concat of a zero block with a static slice -- stays in vregs.
        def shift_prev(z):
            rows = z.shape[0]
            if q == 1:
                return jnp.zeros_like(z)
            return jnp.concatenate(
                [jnp.zeros((rows, n), jnp.float32), z[:, :(q - 1) * n]], axis=1)

        def shift_next(z):
            rows = z.shape[0]
            if q == 1:
                return jnp.zeros_like(z)
            return jnp.concatenate(
                [z[:, n:], jnp.zeros((rows, n), jnp.float32)], axis=1)

        def layer(streams, li):
            m = meta[li]
            rows = m['rows']
            acc = b_ref[li * slot_r:li * slot_r + rows, :]     # bias (pre-bcast)
            cache = {}
            for (s, k, mi, cols) in m['terms']:
                if (s, k) not in cache:
                    z = streams[s]
                    cache[(s, k)] = (z if k == 0 else
                                     shift_prev(z) if k == 1 else shift_next(z))
                w = w_ref[mi * slot_r:mi * slot_r + rows, 0:cols]
                acc = acc + jnp.dot(w, cache[(s, k)],
                                    preferred_element_type=jnp.float32)
            if m['act']:
                acc = jnp.maximum(acc, LEAKY_SLOPE * acc)      # LeakyReLU(0.1)
            return acc

        x = x_ref[...]                       # (8C, NQ)
        r1 = layer([x], 0)                   # down1                  (4C, NQ)
        r2 = layer([layer([r1], 1)], 2)      # down2 -> conv2         (2C, NQ)
        r3 = layer([layer([r2], 3)], 4)      # down3 -> conv3         ( C, NQ)
        u1 = layer([r3], 5)                  # up1                    (2C, NQ)
        u2 = layer([u1, r2], 6)              # up2 on cat(U1, R2)     (4C, NQ)
        u3 = layer([u2, r1], 7)              # up3 on cat(U2, R1)     (8C, NQ)
        o_ref[...] = layer([u3, x], 8)       # out conv on cat(U3, x) (8C, NQ)

    return kernel


# ------------------------------ forward pass ------------------------------- #

def unet1d_forward(x, params):
    n, ch, L = x.shape
    assert L % 8 == 0, "sequence length must be divisible by 8 (3 downsamples)"
    q = L // 8
    nq = n * q
    wpack, bpack, static = prepare_params(params, ch, n, q)

    # phase-major slab: x_slab[r*ch + c, q*n + b] = x[b, c, 8*q + r]
    x_slab = jnp.transpose(x.reshape(n, ch, q, 8), (3, 1, 2, 0)).reshape(8 * ch, nq)

    out_slab = pl.pallas_call(
        _make_kernel(n, q, static),
        out_shape=jax.ShapeDtypeStruct((8 * ch, nq), jnp.float32),
        compiler_params=pltpu.CompilerParams(vmem_limit_bytes=32 * 1024 * 1024),
    )(x_slab, wpack, bpack)

    # back to (N, C, L):  out[b, c, 8*q + r] = out_slab[r*ch + c, q*n + b]
    return jnp.transpose(out_slab.reshape(8, ch, q, n), (3, 1, 2, 0)).reshape(n, ch, L)


# ----------------------------- parameter setup ----------------------------- #

def init_params(key, c):
    keys = iter(jax.random.split(key, 64))

    def conv_bn(ci, co, k):
        return dict(
            w=0.3 * jax.random.normal(next(keys), (co, ci, k), jnp.float32),
            g=1.0 + 0.1 * jax.random.normal(next(keys), (co,), jnp.float32),
            b=0.1 * jax.random.normal(next(keys), (co,), jnp.float32),
            m=0.1 * jax.random.normal(next(keys), (co,), jnp.float32),
            v=jax.random.uniform(next(keys), (co,), jnp.float32, 0.5, 1.5),
        )

    def convT(ci, co, k):
        return dict(
            w=0.3 * jax.random.normal(next(keys), (ci, co, k), jnp.float32),  # torch (Cin, Cout, K)
            bias=0.1 * jax.random.normal(next(keys), (co,), jnp.float32),
        )

    def conv_bias(ci, co, k):
        return dict(
            w=0.3 * jax.random.normal(next(keys), (co, ci, k), jnp.float32),
            bias=0.1 * jax.random.normal(next(keys), (co,), jnp.float32),
        )

    return dict(
        down1=conv_bn(c, c, 3), down2=conv_bn(c, c, 3), conv2=conv_bn(c, c, 3),
        down3=conv_bn(c, c, 3), conv3=conv_bn(c, c, 3),
        up1=convT(c, c, 4), up2=convT(2 * c, c, 4), up3=convT(2 * c, c, 4),
        out=conv_bias(2 * c, c, 3),
    )


# ----------------------------- numpy reference ----------------------------- #

def conv1d_ref(x, w, stride, pad):
    n, ci, l = x.shape
    co, _, k = w.shape
    lo = (l + 2 * pad - k) // stride + 1
    xp = np.pad(x, ((0, 0), (0, 0), (pad, pad)))
    y = np.zeros((n, co, lo), np.float64)
    for o in range(lo):
        y[:, :, o] = np.einsum('oik,nik->no', w, xp[:, :, o * stride:o * stride + k])
    return y


def convT1d_ref(x, w, bias, stride, pad):
    n, ci, l = x.shape
    _, co, k = w.shape
    lo = (l - 1) * stride - 2 * pad + k
    y = np.zeros((n, co, lo), np.float64)
    for j in range(l):
        for t in range(k):
            o = j * stride + t - pad
            if 0 <= o < lo:
                y[:, :, o] += np.einsum('io,ni->no', w[:, :, t], x[:, :, j])
    return y + bias[None, :, None]


def ref_forward(x, P):
    def bn(h, p):
        return (p['g'][None, :, None] * (h - p['m'][None, :, None]) /
                np.sqrt(p['v'][None, :, None] + BN_EPS) + p['b'][None, :, None])

    def lrelu(h, s=LEAKY_SLOPE):
        return np.where(h >= 0, h, s * h)

    def down(h, p):
        return lrelu(bn(conv1d_ref(h, p['w'], 2, 1), p))

    def convblk(h, p):
        return lrelu(bn(conv1d_ref(h, p['w'], 1, 1), p))

    def up(h, feat, p):
        return np.concatenate([lrelu(convT1d_ref(h, p['w'], p['bias'], 2, 1)), feat], axis=1)

    R1 = down(x, P['down1'])
    R2 = convblk(down(R1, P['down2']), P['conv2'])
    R3 = convblk(down(R2, P['down3']), P['conv3'])
    O2 = up(R3, R2, P['up1'])
    O1 = up(O2, R1, P['up2'])
    O0 = up(O1, x, P['up3'])
    return conv1d_ref(O0, P['out']['w'], 1, 1) + P['out']['bias'][None, :, None]


# ---------------------------------- main ----------------------------------- #

if __name__ == "__main__":
    C, N, L = 2, 2, 16                       # in_channel = 2, small 1D grid
    key = jax.random.PRNGKey(0)
    kx, kp = jax.random.split(key)
    x = jax.random.normal(kx, (N, C, L), jnp.float32)
    params = init_params(kp, C)

    out = jax.jit(unet1d_forward)(x, params)
    out = jax.block_until_ready(out)
    assert out.shape == (N, C, L)

    x_np = np.asarray(x, np.float64)
    p_np = jax.tree_util.tree_map(lambda a: np.asarray(a, np.float64), params)
    ref = ref_forward(x_np, p_np)
    np.testing.assert_allclose(np.asarray(out), ref, rtol=1e-3, atol=1e-3)

    print("KERNEL_OK")
</pallas_src>

<mosaic_0001>
module attributes {stable_mosaic.version = 11 : i64} {
  func.func @kernel(%arg0: memref<16x4xf32, #tpu.memory_space<vmem>>, %arg1: memref<528x16xf32, #tpu.memory_space<vmem>>, %arg2: memref<144x4xf32, #tpu.memory_space<vmem>>, %arg3: memref<16x4xf32, #tpu.memory_space<vmem>>) attributes {dimension_semantics = [], scalar_prefetch = 0 : i64, scratch_operands = 0 : i64, tpu.core_type = #tpu.core_type<tc>} {
    %c0 = arith.constant 0 : index
    %c0_0 = arith.constant 0 : index
    %0 = vector.load %arg0[%c0, %c0_0] : memref<16x4xf32, #tpu.memory_space<vmem>>, vector<16x4xf32>
    %c0_1 = arith.constant 0 : index
    %c0_2 = arith.constant 0 : index
    %1 = vector.load %arg2[%c0_1, %c0_2] : memref<144x4xf32, #tpu.memory_space<vmem>>, vector<8x4xf32>
    %c0_3 = arith.constant 0 : index
    %c0_4 = arith.constant 0 : index
    %2 = vector.load %arg1[%c0_3, %c0_4] : memref<528x16xf32, #tpu.memory_space<vmem>>, vector<8x16xf32>
    %cst = arith.constant dense<0.000000e+00> : vector<8x4xf32>
    %3 = tpu.matmul %2, %0, %cst {dimension_numbers = #tpu.dot_dimension_numbers<[1], [0], [0], [1], [0, 0, 1, 1], [], []>} : vector<8x16xf32>, vector<16x4xf32>, vector<8x4xf32> -> vector<8x4xf32>
    %4 = arith.addf %1, %3 : vector<8x4xf32>
    %cst_5 = arith.constant 0.000000e+00 : f32
    %5 = vector.broadcast %cst_5 : f32 to vector<16x2xf32>
    %6 = vector.extract_strided_slice %0 {offsets = [0, 0], sizes = [16, 2], strides = [1, 1]} : vector<16x4xf32> to vector<16x2xf32>
    %7 = tpu.concatenate %5, %6 in 1 : vector<16x2xf32>, vector<16x2xf32> -> vector<16x4xf32>
    %c16 = arith.constant 16 : index
    %c0_6 = arith.constant 0 : index
    %8 = vector.load %arg1[%c16, %c0_6] : memref<528x16xf32, #tpu.memory_space<vmem>>, vector<8x16xf32>
    %cst_7 = arith.constant dense<0.000000e+00> : vector<8x4xf32>
    %9 = tpu.matmul %8, %7, %cst_7 {dimension_numbers = #tpu.dot_dimension_numbers<[1], [0], [0], [1], [0, 0, 1, 1], [], []>} : vector<8x16xf32>, vector<16x4xf32>, vector<8x4xf32> -> vector<8x4xf32>
    %10 = arith.addf %4, %9 : vector<8x4xf32>
    %cst_8 = arith.constant 1.000000e-01 : f32
    %11 = vector.broadcast %cst_8 : f32 to vector<8x4xf32>
    %12 = arith.mulf %11, %10 : vector<8x4xf32>
    %13 = arith.maximumf %10, %12 : vector<8x4xf32>
    %c16_9 = arith.constant 16 : index
    %c0_10 = arith.constant 0 : index
    %14 = vector.load %arg2[%c16_9, %c0_10] : memref<144x4xf32, #tpu.memory_space<vmem>>, vector<4x4xf32>
    %c32 = arith.constant 32 : index
    %c0_11 = arith.constant 0 : index
    %15 = vector.load %arg1[%c32, %c0_11] : memref<528x16xf32, #tpu.memory_space<vmem>>, vector<4x8xf32>
    %cst_12 = arith.constant dense<0.000000e+00> : vector<4x4xf32>
    %16 = tpu.matmul %15, %13, %cst_12 {dimension_numbers = #tpu.dot_dimension_numbers<[1], [0], [0], [1], [0, 0, 1, 1], [], []>} : vector<4x8xf32>, vector<8x4xf32>, vector<4x4xf32> -> vector<4x4xf32>
    %17 = arith.addf %14, %16 : vector<4x4xf32>
    %cst_13 = arith.constant 0.000000e+00 : f32
    %18 = vector.broadcast %cst_13 : f32 to vector<8x2xf32>
    %19 = vector.extract_strided_slice %13 {offsets = [0, 0], sizes = [8, 2], strides = [1, 1]} : vector<8x4xf32> to vector<8x2xf32>
    %20 = tpu.concatenate %18, %19 in 1 : vector<8x2xf32>, vector<8x2xf32> -> vector<8x4xf32>
    %c48 = arith.constant 48 : index
    %c0_14 = arith.constant 0 : index
    %21 = vector.load %arg1[%c48, %c0_14] : memref<528x16xf32, #tpu.memory_space<vmem>>, vector<4x8xf32>
    %cst_15 = arith.constant dense<0.000000e+00> : vector<4x4xf32>
    %22 = tpu.matmul %21, %20, %cst_15 {dimension_numbers = #tpu.dot_dimension_numbers<[1], [0], [0], [1], [0, 0, 1, 1], [], []>} : vector<4x8xf32>, vector<8x4xf32>, vector<4x4xf32> -> vector<4x4xf32>
    %23 = arith.addf %17, %22 : vector<4x4xf32>
    %cst_16 = arith.constant 1.000000e-01 : f32
    %24 = vector.broadcast %cst_16 : f32 to vector<4x4xf32>
    %25 = arith.mulf %24, %23 : vector<4x4xf32>
    %26 = arith.maximumf %23, %25 : vector<4x4xf32>
    %c32_17 = arith.constant 32 : index
    %c0_18 = arith.constant 0 : index
    %27 = vector.load %arg2[%c32_17, %c0_18] : memref<144x4xf32, #tpu.memory_space<vmem>>, vector<4x4xf32>
    %c64 = arith.constant 64 : index
    %c0_19 = arith.constant 0 : index
    %28 = vector.load %arg1[%c64, %c0_19] : memref<528x16xf32, #tpu.memory_space<vmem>>, vector<4x4xf32>
    %cst_20 = arith.constant dense<0.000000e+00> : vector<4x4xf32>
    %29 = tpu.matmul %28, %26, %cst_20 {dimension_numbers = #tpu.dot_dimension_numbers<[1], [0], [0], [1], [0, 0, 1, 1], [], []>} : vector<4x4xf32>, vector<4x4xf32>, vector<4x4xf32> -> vector<4x4xf32>
    %30 = arith.addf %27, %29 : vector<4x4xf32>
    %cst_21 = arith.constant 0.000000e+00 : f32
    %31 = vector.broadcast %cst_21 : f32 to vector<4x2xf32>
    %32 = vector.extract_strided_slice %26 {offsets = [0, 0], sizes = [4, 2], strides = [1, 1]} : vector<4x4xf32> to vector<4x2xf32>
    %33 = tpu.concatenate %31, %32 in 1 : vector<4x2xf32>, vector<4x2xf32> -> vector<4x4xf32>
    %c80 = arith.constant 80 : index
    %c0_22 = arith.constant 0 : index
    %34 = vector.load %arg1[%c80, %c0_22] : memref<528x16xf32, #tpu.memory_space<vmem>>, vector<4x4xf32>
    %cst_23 = arith.constant dense<0.000000e+00> : vector<4x4xf32>
    %35 = tpu.matmul %34, %33, %cst_23 {dimension_numbers = #tpu.dot_dimension_numbers<[1], [0], [0], [1], [0, 0, 1, 1], [], []>} : vector<4x4xf32>, vector<4x4xf32>, vector<4x4xf32> -> vector<4x4xf32>
    %36 = arith.addf %30, %35 : vector<4x4xf32>
    %37 = vector.extract_strided_slice %26 {offsets = [0, 2], sizes = [4, 2], strides = [1, 1]} : vector<4x4xf32> to vector<4x2xf32>
    %cst_24 = arith.constant 0.000000e+00 : f32
    %38 = vector.broadcast %cst_24 : f32 to vector<4x2xf32>
    %39 = tpu.concatenate %37, %38 in 1 : vector<4x2xf32>, vector<4x2xf32> -> vector<4x4xf32>
    %c96 = arith.constant 96 : index
    %c0_25 = arith.constant 0 : index
    %40 = vector.load %arg1[%c96, %c0_25] : memref<528x16xf32, #tpu.memory_space<vmem>>, vector<4x4xf32>
    %cst_26 = arith.constant dense<0.000000e+00> : vector<4x4xf32>
    %41 = tpu.matmul %40, %39, %cst_26 {dimension_numbers = #tpu.dot_dimension_numbers<[1], [0], [0], [1], [0, 0, 1, 1], [], []>} : vector<4x4xf32>, vector<4x4xf32>, vector<4x4xf32> -> vector<4x4xf32>
    %42 = arith.addf %36, %41 : vector<4x4xf32>
    %cst_27 = arith.constant 1.000000e-01 : f32
    %43 = vector.broadcast %cst_27 : f32 to vector<4x4xf32>
    %44 = arith.mulf %43, %42 : vector<4x4xf32>
    %45 = arith.maximumf %42, %44 : vector<4x4xf32>
    %c48_28 = arith.constant 48 : index
    %c0_29 = arith.constant 0 : index
    %46 = vector.load %arg2[%c48_28, %c0_29] : memref<144x4xf32, #tpu.memory_space<vmem>>, vector<2x4xf32>
    %c112 = arith.constant 112 : index
    %c0_30 = arith.constant 0 : index
    %47 = vector.load %arg1[%c112, %c0_30] : memref<528x16xf32, #tpu.memory_space<vmem>>, vector<2x4xf32>
    %cst_31 = arith.constant dense<0.000000e+00> : vector<2x4xf32>
    %48 = tpu.matmul %47, %45, %cst_31 {dimension_numbers = #tpu.dot_dimension_numbers<[1], [0], [0], [1], [0, 0, 1, 1], [], []>} : vector<2x4xf32>, vector<4x4xf32>, vector<2x4xf32> -> vector<2x4xf32>
    %49 = arith.addf %46, %48 : vector<2x4xf32>
    %cst_32 = arith.constant 0.000000e+00 : f32
    %50 = vector.broadcast %cst_32 : f32 to vector<4x2xf32>
    %51 = vector.extract_strided_slice %45 {offsets = [0, 0], sizes = [4, 2], strides = [1, 1]} : vector<4x4xf32> to vector<4x2xf32>
    %52 = tpu.concatenate %50, %51 in 1 : vector<4x2xf32>, vector<4x2xf32> -> vector<4x4xf32>
    %c128 = arith.constant 128 : index
    %c0_33 = arith.constant 0 : index
    %53 = vector.load %arg1[%c128, %c0_33] : memref<528x16xf32, #tpu.memory_space<vmem>>, vector<2x4xf32>
    %cst_34 = arith.constant dense<0.000000e+00> : vector<2x4xf32>
    %54 = tpu.matmul %53, %52, %cst_34 {dimension_numbers = #tpu.dot_dimension_numbers<[1], [0], [0], [1], [0, 0, 1, 1], [], []>} : vector<2x4xf32>, vector<4x4xf32>, vector<2x4xf32> -> vector<2x4xf32>
    %55 = arith.addf %49, %54 : vector<2x4xf32>
    %cst_35 = arith.constant 1.000000e-01 : f32
    %56 = vector.broadcast %cst_35 : f32 to vector<2x4xf32>
    %57 = arith.mulf %56, %55 : vector<2x4xf32>
    %58 = arith.maximumf %55, %57 : vector<2x4xf32>
    %c64_36 = arith.constant 64 : index
    %c0_37 = arith.constant 0 : index
    %59 = vector.load %arg2[%c64_36, %c0_37] : memref<144x4xf32, #tpu.memory_space<vmem>>, vector<2x4xf32>
    %c144 = arith.constant 144 : index
    %c0_38 = arith.constant 0 : index
    %60 = vector.load %arg1[%c144, %c0_38] : memref<528x16xf32, #tpu.memory_space<vmem>>, vector<2x2xf32>
    %cst_39 = arith.constant dense<0.000000e+00> : vector<2x4xf32>
    %61 = tpu.matmul %60, %58, %cst_39 {dimension_numbers = #tpu.dot_dimension_numbers<[1], [0], [0], [1], [0, 0, 1, 1], [], []>} : vector<2x2xf32>, vector<2x4xf32>, vector<2x4xf32> -> vector<2x4xf32>
    %62 = arith.addf %59, %61 : vector<2x4xf32>
    %cst_40 = arith.constant 0.000000e+00 : f32
    %63 = vector.broadcast %cst_40 : f32 to vector<2x2xf32>
    %64 = vector.extract_strided_slice %58 {offsets = [0, 0], sizes = [2, 2], strides = [1, 1]} : vector<2x4xf32> to vector<2x2xf32>
    %65 = tpu.concatenate %63, %64 in 1 : vector<2x2xf32>, vector<2x2xf32> -> vector<2x4xf32>
    %c160 = arith.constant 160 : index
    %c0_41 = arith.constant 0 : index
    %66 = vector.load %arg1[%c160, %c0_41] : memref<528x16xf32, #tpu.memory_space<vmem>>, vector<2x2xf32>
    %cst_42 = arith.constant dense<0.000000e+00> : vector<2x4xf32>
    %67 = tpu.matmul %66, %65, %cst_42 {dimension_numbers = #tpu.dot_dimension_numbers<[1], [0], [0], [1], [0, 0, 1, 1], [], []>} : vector<2x2xf32>, vector<2x4xf32>, vector<2x4xf32> -> vector<2x4xf32>
    %68 = arith.addf %62, %67 : vector<2x4xf32>
    %69 = vector.extract_strided_slice %58 {offsets = [0, 2], sizes = [2, 2], strides = [1, 1]} : vector<2x4xf32> to vector<2x2xf32>
    %cst_43 = arith.constant 0.000000e+00 : f32
    %70 = vector.broadcast %cst_43 : f32 to vector<2x2xf32>
    %71 = tpu.concatenate %69, %70 in 1 : vector<2x2xf32>, vector<2x2xf32> -> vector<2x4xf32>
    %c176 = arith.constant 176 : index
    %c0_44 = arith.constant 0 : index
    %72 = vector.load %arg1[%c176, %c0_44] : memref<528x16xf32, #tpu.memory_space<vmem>>, vector<2x2xf32>
    %cst_45 = arith.constant dense<0.000000e+00> : vector<2x4xf32>
    %73 = tpu.matmul %72, %71, %cst_45 {dimension_numbers = #tpu.dot_dimension_numbers<[1], [0], [0], [1], [0, 0, 1, 1], [], []>} : vector<2x2xf32>, vector<2x4xf32>, vector<2x4xf32> -> vector<2x4xf32>
    %74 = arith.addf %68, %73 : vector<2x4xf32>
    %cst_46 = arith.constant 1.000000e-01 : f32
    %75 = vector.broadcast %cst_46 : f32 to vector<2x4xf32>
    %76 = arith.mulf %75, %74 : vector<2x4xf32>
    %77 = arith.maximumf %74, %76 : vector<2x4xf32>
    %c80_47 = arith.constant 80 : index
    %c0_48 = arith.constant 0 : index
    %78 = vector.load %arg2[%c80_47, %c0_48] : memref<144x4xf32, #tpu.memory_space<vmem>>, vector<4x4xf32>
    %c192 = arith.constant 192 : index
    %c0_49 = arith.constant 0 : index
    %79 = vector.load %arg1[%c192, %c0_49] : memref<528x16xf32, #tpu.memory_space<vmem>>, vector<4x2xf32>
    %cst_50 = arith.constant dense<0.000000e+00> : vector<4x4xf32>
    %80 = tpu.matmul %79, %77, %cst_50 {dimension_numbers = #tpu.dot_dimension_numbers<[1], [0], [0], [1], [0, 0, 1, 1], [], []>} : vector<4x2xf32>, vector<2x4xf32>, vector<4x4xf32> -> vector<4x4xf32>
    %81 = arith.addf %78, %80 : vector<4x4xf32>
    %cst_51 = arith.constant 0.000000e+00 : f32
    %82 = vector.broadcast %cst_51 : f32 to vector<2x2xf32>
    %83 = vector.extract_strided_slice %77 {offsets = [0, 0], sizes = [2, 2], strides = [1, 1]} : vector<2x4xf32> to vector<2x2xf32>
    %84 = tpu.concatenate %82, %83 in 1 : vector<2x2xf32>, vector<2x2xf32> -> vector<2x4xf32>
    %c208 = arith.constant 208 : index
    %c0_52 = arith.constant 0 : index
    %85 = vector.load %arg1[%c208, %c0_52] : memref<528x16xf32, #tpu.memory_space<vmem>>, vector<4x2xf32>
    %cst_53 = arith.constant dense<0.000000e+00> : vector<4x4xf32>
    %86 = tpu.matmul %85, %84, %cst_53 {dimension_numbers = #tpu.dot_dimension_numbers<[1], [0], [0], [1], [0, 0, 1, 1], [], []>} : vector<4x2xf32>, vector<2x4xf32>, vector<4x4xf32> -> vector<4x4xf32>
    %87 = arith.addf %81, %86 : vector<4x4xf32>
    %88 = vector.extract_strided_slice %77 {offsets = [0, 2], sizes = [2, 2], strides = [1, 1]} : vector<2x4xf32> to vector<2x2xf32>
    %cst_54 = arith.constant 0.000000e+00 : f32
    %89 = vector.broadcast %cst_54 : f32 to vector<2x2xf32>
    %90 = tpu.concatenate %88, %89 in 1 : vector<2x2xf32>, vector<2x2xf32> -> vector<2x4xf32>
    %c224 = arith.constant 224 : index
    %c0_55 = arith.constant 0 : index
    %91 = vector.load %arg1[%c224, %c0_55] : memref<528x16xf32, #tpu.memory_space<vmem>>, vector<4x2xf32>
    %cst_56 = arith.constant dense<0.000000e+00> : vector<4x4xf32>
    %92 = tpu.matmul %91, %90, %cst_56 {dimension_numbers = #tpu.dot_dimension_numbers<[1], [0], [0], [1], [0, 0, 1, 1], [], []>} : vector<4x2xf32>, vector<2x4xf32>, vector<4x4xf32> -> vector<4x4xf32>
    %93 = arith.addf %87, %92 : vector<4x4xf32>
    %cst_57 = arith.constant 1.000000e-01 : f32
    %94 = vector.broadcast %cst_57 : f32 to vector<4x4xf32>
    %95 = arith.mulf %94, %93 : vector<4x4xf32>
    %96 = arith.maximumf %93, %95 : vector<4x4xf32>
    %c96_58 = arith.constant 96 : index
    %c0_59 = arith.constant 0 : index
    %97 = vector.load %arg2[%c96_58, %c0_59] : memref<144x4xf32, #tpu.memory_space<vmem>>, vector<8x4xf32>
    %c240 = arith.constant 240 : index
    %c0_60 = arith.constant 0 : index
    %98 = vector.load %arg1[%c240, %c0_60] : memref<528x16xf32, #tpu.memory_space<vmem>>, vector<8x4xf32>
    %cst_61 = arith.constant dense<0.000000e+00> : vector<8x4xf32>
    %99 = tpu.matmul %98, %96, %cst_61 {dimension_numbers = #tpu.dot_dimension_numbers<[1], [0], [0], [1], [0, 0, 1, 1], [], []>} : vector<8x4xf32>, vector<4x4xf32>, vector<8x4xf32> -> vector<8x4xf32>
    %100 = arith.addf %97, %99 : vector<8x4xf32>
    %cst_62 = arith.constant 0.000000e+00 : f32
    %101 = vector.broadcast %cst_62 : f32 to vector<4x2xf32>
    %102 = vector.extract_strided_slice %96 {offsets = [0, 0], sizes = [4, 2], strides = [1, 1]} : vector<4x4xf32> to vector<4x2xf32>
    %103 = tpu.concatenate %101, %102 in 1 : vector<4x2xf32>, vector<4x2xf32> -> vector<4x4xf32>
    %c256 = arith.constant 256 : index
    %c0_63 = arith.constant 0 : index
    %104 = vector.load %arg1[%c256, %c0_63] : memref<528x16xf32, #tpu.memory_space<vmem>>, vector<8x4xf32>
    %cst_64 = arith.constant dense<0.000000e+00> : vector<8x4xf32>
    %105 = tpu.matmul %104, %103, %cst_64 {dimension_numbers = #tpu.dot_dimension_numbers<[1], [0], [0], [1], [0, 0, 1, 1], [], []>} : vector<8x4xf32>, vector<4x4xf32>, vector<8x4xf32> -> vector<8x4xf32>
    %106 = arith.addf %100, %105 : vector<8x4xf32>
    %107 = vector.extract_strided_slice %96 {offsets = [0, 2], sizes = [4, 2], strides = [1, 1]} : vector<4x4xf32> to vector<4x2xf32>
    %cst_65 = arith.constant 0.000000e+00 : f32
    %108 = vector.broadcast %cst_65 : f32 to vector<4x2xf32>
    %109 = tpu.concatenate %107, %108 in 1 : vector<4x2xf32>, vector<4x2xf32> -> vector<4x4xf32>
    %c272 = arith.constant 272 : index
    %c0_66 = arith.constant 0 : index
    %110 = vector.load %arg1[%c272, %c0_66] : memref<528x16xf32, #tpu.memory_space<vmem>>, vector<8x4xf32>
    %cst_67 = arith.constant dense<0.000000e+00> : vector<8x4xf32>
    %111 = tpu.matmul %110, %109, %cst_67 {dimension_numbers = #tpu.dot_dimension_numbers<[1], [0], [0], [1], [0, 0, 1, 1], [], []>} : vector<8x4xf32>, vector<4x4xf32>, vector<8x4xf32> -> vector<8x4xf32>
    %112 = arith.addf %106, %111 : vector<8x4xf32>
    %c288 = arith.constant 288 : index
    %c0_68 = arith.constant 0 : index
    %113 = vector.load %arg1[%c288, %c0_68] : memref<528x16xf32, #tpu.memory_space<vmem>>, vector<8x4xf32>
    %cst_69 = arith.constant dense<0.000000e+00> : vector<8x4xf32>
    %114 = tpu.matmul %113, %45, %cst_69 {dimension_numbers = #tpu.dot_dimension_numbers<[1], [0], [0], [1], [0, 0, 1, 1], [], []>} : vector<8x4xf32>, vector<4x4xf32>, vector<8x4xf32> -> vector<8x4xf32>
    %115 = arith.addf %112, %114 : vector<8x4xf32>
    %cst_70 = arith.constant 0.000000e+00 : f32
    %116 = vector.broadcast %cst_70 : f32 to vector<4x2xf32>
    %117 = vector.extract_strided_slice %45 {offsets = [0, 0], sizes = [4, 2], strides = [1, 1]} : vector<4x4xf32> to vector<4x2xf32>
    %118 = tpu.concatenate %116, %117 in 1 : vector<4x2xf32>, vector<4x2xf32> -> vector<4x4xf32>
    %c304 = arith.constant 304 : index
    %c0_71 = arith.constant 0 : index
    %119 = vector.load %arg1[%c304, %c0_71] : memref<528x16xf32, #tpu.memory_space<vmem>>, vector<8x4xf32>
    %cst_72 = arith.constant dense<0.000000e+00> : vector<8x4xf32>
    %120 = tpu.matmul %119, %118, %cst_72 {dimension_numbers = #tpu.dot_dimension_numbers<[1], [0], [0], [1], [0, 0, 1, 1], [], []>} : vector<8x4xf32>, vector<4x4xf32>, vector<8x4xf32> -> vector<8x4xf32>
    %121 = arith.addf %115, %120 : vector<8x4xf32>
    %122 = vector.extract_strided_slice %45 {offsets = [0, 2], sizes = [4, 2], strides = [1, 1]} : vector<4x4xf32> to vector<4x2xf32>
    %cst_73 = arith.constant 0.000000e+00 : f32
    %123 = vector.broadcast %cst_73 : f32 to vector<4x2xf32>
    %124 = tpu.concatenate %122, %123 in 1 : vector<4x2xf32>, vector<4x2xf32> -> vector<4x4xf32>
    %c320 = arith.constant 320 : index
    %c0_74 = arith.constant 0 : index
    %125 = vector.load %arg1[%c320, %c0_74] : memref<528x16xf32, #tpu.memory_space<vmem>>, vector<8x4xf32>
    %cst_75 = arith.constant dense<0.000000e+00> : vector<8x4xf32>
    %126 = tpu.matmul %125, %124, %cst_75 {dimension_numbers = #tpu.dot_dimension_numbers<[1], [0], [0], [1], [0, 0, 1, 1], [], []>} : vector<8x4xf32>, vector<4x4xf32>, vector<8x4xf32> -> vector<8x4xf32>
    %127 = arith.addf %121, %126 : vector<8x4xf32>
    %cst_76 = arith.constant 1.000000e-01 : f32
    %128 = vector.broadcast %cst_76 : f32 to vector<8x4xf32>
    %129 = arith.mulf %128, %127 : vector<8x4xf32>
    %130 = arith.maximumf %127, %129 : vector<8x4xf32>
    %c112_77 = arith.constant 112 : index
    %c0_78 = arith.constant 0 : index
    %131 = vector.load %arg2[%c112_77, %c0_78] : memref<144x4xf32, #tpu.memory_space<vmem>>, vector<16x4xf32>
    %c336 = arith.constant 336 : index
    %c0_79 = arith.constant 0 : index
    %132 = vector.load %arg1[%c336, %c0_79] : memref<528x16xf32, #tpu.memory_space<vmem>>, vector<16x8xf32>
    %cst_80 = arith.constant dense<0.000000e+00> : vector<16x4xf32>
    %133 = tpu.matmul %132, %130, %cst_80 {dimension_numbers = #tpu.dot_dimension_numbers<[1], [0], [0], [1], [0, 0, 1, 1], [], []>} : vector<16x8xf32>, vector<8x4xf32>, vector<16x4xf32> -> vector<16x4xf32>
    %134 = arith.addf %131, %133 : vector<16x4xf32>
    %cst_81 = arith.constant 0.000000e+00 : f32
    %135 = vector.broadcast %cst_81 : f32 to vector<8x2xf32>
    %136 = vector.extract_strided_slice %130 {offsets = [0, 0], sizes = [8, 2], strides = [1, 1]} : vector<8x4xf32> to vector<8x2xf32>
    %137 = tpu.concatenate %135, %136 in 1 : vector<8x2xf32>, vector<8x2xf32> -> vector<8x4xf32>
    %c352 = arith.constant 352 : index
    %c0_82 = arith.constant 0 : index
    %138 = vector.load %arg1[%c352, %c0_82] : memref<528x16xf32, #tpu.memory_space<vmem>>, vector<16x8xf32>
    %cst_83 = arith.constant dense<0.000000e+00> : vector<16x4xf32>
    %139 = tpu.matmul %138, %137, %cst_83 {dimension_numbers = #tpu.dot_dimension_numbers<[1], [0], [0], [1], [0, 0, 1, 1], [], []>} : vector<16x8xf32>, vector<8x4xf32>, vector<16x4xf32> -> vector<16x4xf32>
    %140 = arith.addf %134, %139 : vector<16x4xf32>
    %141 = vector.extract_strided_slice %130 {offsets = [0, 2], sizes = [8, 2], strides = [1, 1]} : vector<8x4xf32> to vector<8x2xf32>
    %cst_84 = arith.constant 0.000000e+00 : f32
    %142 = vector.broadcast %cst_84 : f32 to vector<8x2xf32>
    %143 = tpu.concatenate %141, %142 in 1 : vector<8x2xf32>, vector<8x2xf32> -> vector<8x4xf32>
    %c368 = arith.constant 368 : index
    %c0_85 = arith.constant 0 : index
    %144 = vector.load %arg1[%c368, %c0_85] : memref<528x16xf32, #tpu.memory_space<vmem>>, vector<16x8xf32>
    %cst_86 = arith.constant dense<0.000000e+00> : vector<16x4xf32>
    %145 = tpu.matmul %144, %143, %cst_86 {dimension_numbers = #tpu.dot_dimension_numbers<[1], [0], [0], [1], [0, 0, 1, 1], [], []>} : vector<16x8xf32>, vector<8x4xf32>, vector<16x4xf32> -> vector<16x4xf32>
    %146 = arith.addf %140, %145 : vector<16x4xf32>
    %c384 = arith.constant 384 : index
    %c0_87 = arith.constant 0 : index
    %147 = vector.load %arg1[%c384, %c0_87] : memref<528x16xf32, #tpu.memory_space<vmem>>, vector<16x8xf32>
    %cst_88 = arith.constant dense<0.000000e+00> : vector<16x4xf32>
    %148 = tpu.matmul %147, %13, %cst_88 {dimension_numbers = #tpu.dot_dimension_numbers<[1], [0], [0], [1], [0, 0, 1, 1], [], []>} : vector<16x8xf32>, vector<8x4xf32>, vector<16x4xf32> -> vector<16x4xf32>
    %149 = arith.addf %146, %148 : vector<16x4xf32>
    %cst_89 = arith.constant 0.000000e+00 : f32
    %150 = vector.broadcast %cst_89 : f32 to vector<8x2xf32>
    %151 = vector.extract_strided_slice %13 {offsets = [0, 0], sizes = [8, 2], strides = [1, 1]} : vector<8x4xf32> to vector<8x2xf32>
    %152 = tpu.concatenate %150, %151 in 1 : vector<8x2xf32>, vector<8x2xf32> -> vector<8x4xf32>
    %c400 = arith.constant 400 : index
    %c0_90 = arith.constant 0 : index
    %153 = vector.load %arg1[%c400, %c0_90] : memref<528x16xf32, #tpu.memory_space<vmem>>, vector<16x8xf32>
    %cst_91 = arith.constant dense<0.000000e+00> : vector<16x4xf32>
    %154 = tpu.matmul %153, %152, %cst_91 {dimension_numbers = #tpu.dot_dimension_numbers<[1], [0], [0], [1], [0, 0, 1, 1], [], []>} : vector<16x8xf32>, vector<8x4xf32>, vector<16x4xf32> -> vector<16x4xf32>
    %155 = arith.addf %149, %154 : vector<16x4xf32>
    %156 = vector.extract_strided_slice %13 {offsets = [0, 2], sizes = [8, 2], strides = [1, 1]} : vector<8x4xf32> to vector<8x2xf32>
    %cst_92 = arith.constant 0.000000e+00 : f32
    %157 = vector.broadcast %cst_92 : f32 to vector<8x2xf32>
    %158 = tpu.concatenate %156, %157 in 1 : vector<8x2xf32>, vector<8x2xf32> -> vector<8x4xf32>
    %c416 = arith.constant 416 : index
    %c0_93 = arith.constant 0 : index
    %159 = vector.load %arg1[%c416, %c0_93] : memref<528x16xf32, #tpu.memory_space<vmem>>, vector<16x8xf32>
    %cst_94 = arith.constant dense<0.000000e+00> : vector<16x4xf32>
    %160 = tpu.matmul %159, %158, %cst_94 {dimension_numbers = #tpu.dot_dimension_numbers<[1], [0], [0], [1], [0, 0, 1, 1], [], []>} : vector<16x8xf32>, vector<8x4xf32>, vector<16x4xf32> -> vector<16x4xf32>
    %161 = arith.addf %155, %160 : vector<16x4xf32>
    %cst_95 = arith.constant 1.000000e-01 : f32
    %162 = vector.broadcast %cst_95 : f32 to vector<16x4xf32>
    %163 = arith.mulf %162, %161 : vector<16x4xf32>
    %164 = arith.maximumf %161, %163 : vector<16x4xf32>
    %c128_96 = arith.constant 128 : index
    %c0_97 = arith.constant 0 : index
    %165 = vector.load %arg2[%c128_96, %c0_97] : memref<144x4xf32, #tpu.memory_space<vmem>>, vector<16x4xf32>
    %c432 = arith.constant 432 : index
    %c0_98 = arith.constant 0 : index
    %166 = vector.load %arg1[%c432, %c0_98] : memref<528x16xf32, #tpu.memory_space<vmem>>, vector<16x16xf32>
    %cst_99 = arith.constant dense<0.000000e+00> : vector<16x4xf32>
    %167 = tpu.matmul %166, %164, %cst_99 {dimension_numbers = #tpu.dot_dimension_numbers<[1], [0], [0], [1], [0, 0, 1, 1], [], []>} : vector<16x16xf32>, vector<16x4xf32>, vector<16x4xf32> -> vector<16x4xf32>
    %168 = arith.addf %165, %167 : vector<16x4xf32>
    %cst_100 = arith.constant 0.000000e+00 : f32
    %169 = vector.broadcast %cst_100 : f32 to vector<16x2xf32>
    %170 = vector.extract_strided_slice %164 {offsets = [0, 0], sizes = [16, 2], strides = [1, 1]} : vector<16x4xf32> to vector<16x2xf32>
    %171 = tpu.concatenate %169, %170 in 1 : vector<16x2xf32>, vector<16x2xf32> -> vector<16x4xf32>
    %c448 = arith.constant 448 : index
    %c0_101 = arith.constant 0 : index
    %172 = vector.load %arg1[%c448, %c0_101] : memref<528x16xf32, #tpu.memory_space<vmem>>, vector<16x16xf32>
    %cst_102 = arith.constant dense<0.000000e+00> : vector<16x4xf32>
    %173 = tpu.matmul %172, %171, %cst_102 {dimension_numbers = #tpu.dot_dimension_numbers<[1], [0], [0], [1], [0, 0, 1, 1], [], []>} : vector<16x16xf32>, vector<16x4xf32>, vector<16x4xf32> -> vector<16x4xf32>
    %174 = arith.addf %168, %173 : vector<16x4xf32>
    %175 = vector.extract_strided_slice %164 {offsets = [0, 2], sizes = [16, 2], strides = [1, 1]} : vector<16x4xf32> to vector<16x2xf32>
    %cst_103 = arith.constant 0.000000e+00 : f32
    %176 = vector.broadcast %cst_103 : f32 to vector<16x2xf32>
    %177 = tpu.concatenate %175, %176 in 1 : vector<16x2xf32>, vector<16x2xf32> -> vector<16x4xf32>
    %c464 = arith.constant 464 : index
    %c0_104 = arith.constant 0 : index
    %178 = vector.load %arg1[%c464, %c0_104] : memref<528x16xf32, #tpu.memory_space<vmem>>, vector<16x16xf32>
    %cst_105 = arith.constant dense<0.000000e+00> : vector<16x4xf32>
    %179 = tpu.matmul %178, %177, %cst_105 {dimension_numbers = #tpu.dot_dimension_numbers<[1], [0], [0], [1], [0, 0, 1, 1], [], []>} : vector<16x16xf32>, vector<16x4xf32>, vector<16x4xf32> -> vector<16x4xf32>
    %180 = arith.addf %174, %179 : vector<16x4xf32>
    %c480 = arith.constant 480 : index
    %c0_106 = arith.constant 0 : index
    %181 = vector.load %arg1[%c480, %c0_106] : memref<528x16xf32, #tpu.memory_space<vmem>>, vector<16x16xf32>
    %cst_107 = arith.constant dense<0.000000e+00> : vector<16x4xf32>
    %182 = tpu.matmul %181, %0, %cst_107 {dimension_numbers = #tpu.dot_dimension_numbers<[1], [0], [0], [1], [0, 0, 1, 1], [], []>} : vector<16x16xf32>, vector<16x4xf32>, vector<16x4xf32> -> vector<16x4xf32>
    %183 = arith.addf %180, %182 : vector<16x4xf32>
    %cst_108 = arith.constant 0.000000e+00 : f32
    %184 = vector.broadcast %cst_108 : f32 to vector<16x2xf32>
    %185 = vector.extract_strided_slice %0 {offsets = [0, 0], sizes = [16, 2], strides = [1, 1]} : vector<16x4xf32> to vector<16x2xf32>
    %186 = tpu.concatenate %184, %185 in 1 : vector<16x2xf32>, vector<16x2xf32> -> vector<16x4xf32>
    %c496 = arith.constant 496 : index
    %c0_109 = arith.constant 0 : index
    %187 = vector.load %arg1[%c496, %c0_109] : memref<528x16xf32, #tpu.memory_space<vmem>>, vector<16x16xf32>
    %cst_110 = arith.constant dense<0.000000e+00> : vector<16x4xf32>
    %188 = tpu.matmul %187, %186, %cst_110 {dimension_numbers = #tpu.dot_dimension_numbers<[1], [0], [0], [1], [0, 0, 1, 1], [], []>} : vector<16x16xf32>, vector<16x4xf32>, vector<16x4xf32> -> vector<16x4xf32>
    %189 = arith.addf %183, %188 : vector<16x4xf32>
    %190 = vector.extract_strided_slice %0 {offsets = [0, 2], sizes = [16, 2], strides = [1, 1]} : vector<16x4xf32> to vector<16x2xf32>
    %cst_111 = arith.constant 0.000000e+00 : f32
    %191 = vector.broadcast %cst_111 : f32 to vector<16x2xf32>
    %192 = tpu.concatenate %190, %191 in 1 : vector<16x2xf32>, vector<16x2xf32> -> vector<16x4xf32>
    %c512 = arith.constant 512 : index
    %c0_112 = arith.constant 0 : index
    %193 = vector.load %arg1[%c512, %c0_112] : memref<528x16xf32, #tpu.memory_space<vmem>>, vector<16x16xf32>
    %cst_113 = arith.constant dense<0.000000e+00> : vector<16x4xf32>
    %194 = tpu.matmul %193, %192, %cst_113 {dimension_numbers = #tpu.dot_dimension_numbers<[1], [0], [0], [1], [0, 0, 1, 1], [], []>} : vector<16x16xf32>, vector<16x4xf32>, vector<16x4xf32> -> vector<16x4xf32>
    %195 = arith.addf %189, %194 : vector<16x4xf32>
    %c0_114 = arith.constant 0 : index
    %c0_115 = arith.constant 0 : index
    %196 = vector.load %arg3[%c0_114, %c0_115] : memref<16x4xf32, #tpu.memory_space<vmem>>, vector<16x4xf32>
    tpu.vector_store %arg3[%c0_114, %c0_115], %195 {strides = array<i32>} : memref<16x4xf32, #tpu.memory_space<vmem>>, vector<16x4xf32>,
    return
  }
}

</mosaic_0001>

<bundles_post_ra>
// kernel: tile.52
= control target key start
LH: loop header
LB: loop body
LE: loop exit
PB: predicated region body
PF: predicated region fallthrough
CT: control target
= control target key end

     0   :  { %s22_s0 = inlined_call_operand.vmem [shape: f32[2], index: 0, kind: input, shape index: {}]   ;;  %s23_s1 = inlined_call_operand.vmem [shape: f32[2,2], index: 1, kind: output, shape index: {}]  }
   0x1   :  { %v4_v0 = vld [vmem:[%s22_s0] ss:$0 sm:$0xff] }
   0x2   :  { %5 = vst [vmem:[%s23_s1] sm:$0x3] %v4_v0 }

// kernel: tile.40
= control target key start
LH: loop header
LB: loop body
LE: loop exit
PB: predicated region body
PF: predicated region fallthrough
CT: control target
= control target key end

     0   :  { %s22_s0 = inlined_call_operand.vmem [shape: f32[2], index: 0, kind: input, shape index: {}]   ;;  %s23_s1 = inlined_call_operand.vmem [shape: f32[4,2], index: 1, kind: output, shape index: {}]  }
   0x1   :  { %v4_v0 = vld [vmem:[%s22_s0] ss:$0 sm:$0xff] }
   0x2   :  { %5 = vst [vmem:[%s23_s1] sm:$0xf] %v4_v0 }

// kernel: tile.64
= control target key start
LH: loop header
LB: loop body
LE: loop exit
PB: predicated region body
PF: predicated region fallthrough
CT: control target
= control target key end

     0   :  { %s22_s0 = inlined_call_operand.vmem [shape: f32[2], index: 0, kind: input, shape index: {}]   ;;  %s23_s1 = inlined_call_operand.vmem [shape: f32[8,2], index: 1, kind: output, shape index: {}]  }
   0x1   :  { %v4_v0 = vld [vmem:[%s22_s0] ss:$0 sm:$0xff] }
   0x2   :  { %5 = vst [vmem:[%s23_s1] sm:$0xff] %v4_v0 }

// kernel: unet1d_forward.1
= control target key start
LH: loop header
LB: loop body
LE: loop exit
PB: predicated region body
PF: predicated region fallthrough
CT: control target
= control target key end

     0   :  { %s1205_s14 = smov 2   ;;  %vm18_vm0 = vcmask 130048   ;;  %vm51_vm1 = vcmask 15360   ;;  %vm83_vm3 = vcmask 64512   ;;  %vm146_vm4 = vcmask 1043456   ;;  %s1206_s28 = smov 126   ;;  %s1566_s0 = inlined_call_operand.vmem [shape: f32[16,4], index: 0, kind: input, shape index: {}]   ;;  %s1567_s1 = inlined_call_operand.vmem [shape: f32[528,16], index: 1, kind: input, shape index: {}]   ;;  %s1568_s2 = inlined_call_operand.vmem [shape: f32[144,4], index: 2, kind: input, shape index: {}]   ;;  %s1569_s3 = inlined_call_operand.vmem [shape: f32[16,4], index: 3, kind: output, shape index: {}]  }
   0x1   :  { %v1230_v0 = vld [vmem:[%s1566_s0 + $0x8] sm:$0xff]  ;;  %v1238_v1 = vld [vmem:[%s1566_s0] sm:$0xff]  ;;  %vm1248_vm2 = vmneg %vm51_vm1  ;;  %vm142_vm5 = vcmask 31744   ;;  %vm305_vm6 = vcmask 1041408  }
   0x2   :  { %47 = vrot.lane.b32.xlu0 %v1230_v0, %s1205_s14  ;;  %36 = vmatpush.msra.mxu0 %v1230_v0  ;;  %v17_v2 = vld [vmem:[%s1567_s1] sm:$0xff]  ;;  %v54_v5 = vld [vmem:[%s1567_s1 + $0x10] sm:$0xff]  ;;  %v972_v3 = vld [vmem:[%s1567_s1 + $0x1d8] sm:$0xff] }
   0x3   :  { %v16_v7 = vld [vmem:[%s1568_s2] sm:$0xff]  ;;  %v113_v15 = vld [vmem:[%s1567_s1 + $0x30] sm:$0xf] }
   0x4   :  { %37 = vmatpush.msra.mxu0 %v1238_v1  ;;  %v82_v14 = vld [vmem:[%s1567_s1 + $0x20] sm:$0xf]  ;;  %v81_v17 = vld [vmem:[%s1568_s2 + $0x10] sm:$0xf] }
   0x5   :  { %1117 = vmatmul.msk.f32.vlgmr.msra.gmra.mxu0 %vm18_vm0, %v17_v2  ;;  %v141_v24 = vld [vmem:[%s1567_s1 + $0x40] sm:$0xf]  ;;  %v175_v29 = vld [vmem:[%s1567_s1 + $0x50] sm:$0xf] }
   0x6   :  { %v207_v26 = vld [vmem:[%s1567_s1 + $0x60] sm:$0xf]  ;;  %v238_v40 = vld [vmem:[%s1567_s1 + $0x70] sm:$0x3] }
   0x7   :  { %v140_v31 = vld [vmem:[%s1568_s2 + $0x20] sm:$0xf]  ;;  %v237_v44 = vld [vmem:[%s1568_s2 + $0x30] sm:$0x3] }
   0x8   :  { %v270_v42 = vld [vmem:[%s1567_s1 + $0x80] sm:$0x3]  ;;  %v301_v51 = vld [vmem:[%s1567_s1 + $0x90] sm:$0x3] }
   0x9   :  { %v334_v54 = vld [vmem:[%s1567_s1 + $0xa0] sm:$0x3]  ;;  %v366_v55 = vld [vmem:[%s1567_s1 + $0xb0] sm:$0x3] }
   0xa   :  { %45 = vrot.lane.b32.xlu0 %v1238_v1, %s1205_s14  ;;  %v300_v58 = vld [vmem:[%s1568_s2 + $0x40] sm:$0x3] }
  0x74   :  { %v1252_v4 = vpop.permute.xlu0 %47 }
  0x75   :  { %1119 = vmatpush.msk.msra.mxu1 %vm1248_vm2, %v1252_v4 }
  0x7c   :  { %v1260_v6 = vpop.permute.xlu0 %45 }
  0x7d   :  { %1121 = vmatpush.msk.msra.mxu1 %vm1248_vm2, %v1260_v6 }
  0x7e   :  { %1122 = vmatmul.msk.f32.vlgmr.msra.gmra.mxu1 %vm18_vm0, %v54_v5 }
  0x82   :  { %v39_v8 = vpop.f32.mrf.mxu0 }
  0x83   :  { %v42_v9 = vadd.f32 %v39_v8, %v16_v7  ;;  %v397_v8 = vld [vmem:[%s1567_s1 + $0xc0] sm:$0xf] }
  0xfb   :  { %v75_v10 = vpop.f32.mrf.mxu1 }
  0xfc   :  { %v78_v11 = vadd.f32 %v75_v10, %v42_v9  ;;  %v429_v10 = vld [vmem:[%s1567_s1 + $0xd0] sm:$0xf] }
  0xfe   :  { %v79_v12 = vmul.f32 0.1, %v78_v11 }
 0x100   :  { %v1269_v13 = vmax.f32 %v78_v11, %v79_v12 }
 0x102   :  { %109 = vrot.lane.b32.xlu1 %v1269_v13, %s1205_s14  ;;  %102 = vmatpush.msra.mxu2 %v1269_v13 }
 0x103   :  { %1123 = vmatmul.msk.f32.vlgmr.msra.gmra.mxu2 %vm83_vm3, %v82_v14  ;;  %v461_v14 = vld [vmem:[%s1567_s1 + $0xe0] sm:$0xf] }
 0x174   :  { %v1281_v16 = vpop.permute.xlu1 %109 }
 0x175   :  { %1125 = vmatpush.msk.msra.mxu3 %vm1248_vm2, %v1281_v16 }
 0x176   :  { %1126 = vmatmul.msk.f32.vlgmr.msra.gmra.mxu3 %vm83_vm3, %v113_v15 }
 0x186   :  { %v104_v18 = vpop.f32.mrf.mxu2 }
 0x187   :  { %v107_v19 = vadd.f32 %v104_v18, %v81_v17  ;;  %v396_v17 = vld [vmem:[%s1568_s2 + $0x50] sm:$0xf] }
 0x1f9   :  { %v134_v20 = vpop.f32.mrf.mxu3 }
 0x1fa   :  { %v137_v21 = vadd.f32 %v134_v20, %v107_v19 }
 0x1fc   :  { %v138_v22 = vmul.f32 0.1, %v137_v21 }
 0x1fe   :  { %v139_v23 = vmax.f32 %v137_v21, %v138_v22 }
 0x200   :  { %203 = vrot.lane.b32.xlu2 %v139_v23, %s1206_s28  ;;  %171 = vrot.lane.b32.xlu1 %v139_v23, %s1205_s14 }
 0x201   :  { %1127 = vmatpush.msk.msrb.mxu2 %vm146_vm4, %v139_v23 }
 0x202   :  { %1128 = vmatmul.msk.f32.vlgmr.msrb.gmra.mxu2 %vm142_vm5, %v141_v24 }
 0x25a   :  { %v204_v25 = vpop.permute.xlu2 %203 }
 0x25b   :  { %v206_v27 = vsel %vm51_vm1, %v204_v25, 0.0 }
 0x25c   :  { %1131 = vmatpush.msk.msrb.mxu0 %vm146_vm4, %v206_v27 }
 0x25d   :  { %1132 = vmatmul.msk.f32.vlgmr.msrb.gmra.mxu0 %vm142_vm5, %v207_v26  ;;  %v492_v26 = vld [vmem:[%s1567_s1 + $0xf0] sm:$0xff] }
 0x272   :  { %v172_v28 = vpop.permute.xlu1 %171 }
 0x273   :  { %v174_v30 = vsel %vm51_vm1, 0.0, %v172_v28  ;;  %v556_v28 = vld [vmem:[%s1567_s1 + $0x110] sm:$0xff] }
 0x274   :  { %1129 = vmatpush.msk.msrb.mxu3 %vm146_vm4, %v174_v30  ;;  %v584_v30 = vld [vmem:[%s1567_s1 + $0x120] sm:$0xff] }
 0x275   :  { %1130 = vmatmul.msk.f32.vlgmr.msrb.gmra.mxu3 %vm142_vm5, %v175_v29 }
 0x285   :  { %v167_v32 = vpop.f32.mrf.mxu2 }
 0x286   :  { %v170_v33 = vadd.f32 %v167_v32, %v140_v31  ;;  %v609_v31 = vld [vmem:[%s1567_s1 + $0x130] sm:$0xff] }
 0x2da   :  { %v231_v35 = vpop.f32.mrf.mxu0 }
 0x2f8   :  { %v199_v34 = vpop.f32.mrf.mxu3 }
 0x2f9   :  { %v202_v36 = vadd.f32 %v199_v34, %v170_v33  ;;  %v524_v34 = vld [vmem:[%s1567_s1 + $0x100] sm:$0xff] }
 0x2fb   :  { %v234_v37 = vadd.f32 %v231_v35, %v202_v36 }
 0x2fd   :  { %v235_v38 = vmul.f32 0.1, %v234_v37 }
 0x2ff   :  { %v236_v39 = vmax.f32 %v234_v37, %v235_v38  ;;  %v638_v37 = vld [vmem:[%s1567_s1 + $0x140] sm:$0xff] }
 0x300   :  { %v491_v38 = vld [vmem:[%s1568_s2 + $0x60] sm:$0xff] }
 0x301   :  { %266 = vrot.lane.b32.xlu2 %v236_v39, %s1205_s14  ;;  %1133 = vmatpush.msk.msrb.mxu1 %vm146_vm4, %v236_v39 }
 0x302   :  { %1134 = vmatmul.msk.f32.vlgmr.msrb.gmra.mxu1 %vm142_vm5, %v238_v40 }
 0x35b   :  { %v267_v41 = vpop.permute.xlu2 %266 }
 0x35c   :  { %v1322_v43 = vsel %vm51_vm1, 0.0, %v267_v41 }
 0x35d   :  { %1135 = vmatpush.msk.msra.mxu2 %vm146_vm4, %v1322_v43 }
 0x35e   :  { %1136 = vmatmul.msk.f32.vlgmr.msra.gmra.mxu2 %vm142_vm5, %v270_v42 }
 0x37f   :  { %v262_v45 = vpop.f32.mrf.mxu1 }
 0x380   :  { %v265_v46 = vadd.f32 %v262_v45, %v237_v44 }
 0x3e1   :  { %v294_v47 = vpop.f32.mrf.mxu2 }
 0x3e2   :  { %v297_v48 = vadd.f32 %v294_v47, %v265_v46 }
 0x3e4   :  { %v298_v49 = vmul.f32 0.1, %v297_v48 }
 0x3e6   :  { %v299_v50 = vmax.f32 %v297_v48, %v298_v49 }
 0x3e8   :  { %362 = vrot.lane.b32.xlu1 %v299_v50, %s1206_s28  ;;  %330 = vrot.lane.b32.xlu0 %v299_v50, %s1205_s14 }
 0x3e9   :  { %1137 = vmatpush.msk.msra.mxu3 %vm305_vm6, %v299_v50 }
 0x3ea   :  { %1138 = vmatmul.msk.f32.vlgmr.msra.gmra.mxu3 %vm51_vm1, %v301_v51 }
 0x45a   :  { %v363_v52 = vpop.permute.xlu1 %362  ;;  %v331_v53 = vpop.permute.xlu0 %330 }
 0x45b   :  { %v365_v56 = vsel %vm51_vm1, %v363_v52, 0.0  ;;  %v333_v57 = vsel %vm51_vm1, 0.0, %v331_v53  ;;  %v670_v52 = vld [vmem:[%s1567_s1 + $0x150] sm:$0xff]  ;;  %v778_v53 = vld [vmem:[%s1567_s1 + $0x180] sm:$0xff] }
 0x45c   :  { %1139 = vmatpush.msk.msra.mxu0 %vm305_vm6, %v333_v57  ;;  %1141 = vmatpush.msk.msra.mxu1 %vm305_vm6, %v365_v56  ;;  %v745_v56 = vld [vmem:[%s1567_s1 + $0x170] sm:$0xff] }
 0x45d   :  { %1140 = vmatmul.msk.f32.vlgmr.msra.gmra.mxu0 %vm51_vm1, %v334_v54  ;;  %1142 = vmatmul.msk.f32.vlgmr.msra.gmra.mxu1 %vm51_vm1, %v366_v55  ;;  %v671_v54 = vld [vmem:[%s1567_s1 + $0x158] sm:$0xff]  ;;  %v779_v55 = vld [vmem:[%s1567_s1 + $0x188] sm:$0xff] }
 0x46d   :  { %v326_v59 = vpop.f32.mrf.mxu3 }
 0x46e   :  { %v329_v60 = vadd.f32 %v326_v59, %v300_v58  ;;  %v812_v58 = vld [vmem:[%s1567_s1 + $0x198] sm:$0xff] }
 0x46f   :  { %v746_v59 = vld [vmem:[%s1567_s1 + $0x178] sm:$0xff] }
 0x4da   :  { %v358_v61 = vpop.f32.mrf.mxu0  ;;  %v390_v62 = vpop.f32.mrf.mxu1 }
 0x4db   :  { %v361_v63 = vadd.f32 %v358_v61, %v329_v60  ;;  %v708_v60 = vld [vmem:[%s1567_s1 + $0x160] sm:$0xff] }
 0x4dd   :  { %v393_v2 = vadd.f32 %v390_v62, %v361_v63  ;;  %v709_v63 = vld [vmem:[%s1567_s1 + $0x168] sm:$0xff] }
 0x4df   :  { %v394_v5 = vmul.f32 0.1, %v393_v2 }
 0x4e1   :  { %v395_v7 = vmax.f32 %v393_v2, %v394_v5  ;;  %v848_v2 = vld [vmem:[%s1567_s1 + $0x1a0] sm:$0xff]  ;;  %v849_v5 = vld [vmem:[%s1567_s1 + $0x1a8] sm:$0xff] }
 0x4e3   :  { %457 = vrot.lane.b32.xlu0 %v395_v7, %s1206_s28  ;;  %425 = vrot.lane.b32.xlu2 %v395_v7, %s1205_s14 }
 0x4e4   :  { %1143 = vmatpush.msk.msrb.mxu2 %vm305_vm6, %v395_v7 }
 0x4e5   :  { %1144 = vmatmul.msk.f32.vlgmr.msrb.gmra.mxu2 %vm51_vm1, %v397_v8  ;;  %v668_v8 = vld [vmem:[%s1568_s2 + $0x70] sm:$0xff] }
 0x4eb   :  { %634 = vrot.lane.b32.xlu0 %v236_v39, %s1206_s28 }
 0x4f3   :  { %844 = vrot.lane.b32.xlu0 %v1269_v13, %s1206_s28 }
 0x53d   :  { %v426_v9 = vpop.permute.xlu2 %425 }
 0x53e   :  { %v428_v11 = vsel %vm51_vm1, 0.0, %v426_v9 }
 0x53f   :  { %1145 = vmatpush.msk.msrb.mxu3 %vm305_vm6, %v428_v11 }
 0x540   :  { %1146 = vmatmul.msk.f32.vlgmr.msrb.gmra.mxu3 %vm51_vm1, %v429_v10 }
 0x555   :  { %v458_v12 = vpop.permute.xlu0 %457 }
 0x556   :  { %v460_v15 = vsel %vm51_vm1, %v458_v12, 0.0 }
 0x557   :  { %1147 = vmatpush.msk.msrb.mxu0 %vm305_vm6, %v460_v15  ;;  %v669_v15 = vld [vmem:[%s1568_s2 + $0x78] sm:$0xff] }
 0x558   :  { %1148 = vmatmul.msk.f32.vlgmr.msrb.gmra.mxu0 %vm51_vm1, %v461_v14 }
 0x559   :  { %1155 = vmatpush.msk.msra.mxu0 %vm146_vm4, %v236_v39 }
 0x55d   :  { %v635_v32 = vpop.permute.xlu0 %634 }
 0x55e   :  { %v637_v36 = vsel %vm51_vm1, %v635_v32, 0.0 }
 0x560   :  { %1156 = vmatmul.msk.f32.vlgmr.msra.gmra.mxu0 %vm142_vm5, %v584_v30 }
 0x565   :  { %v845_v62 = vpop.permute.xlu0 %844 }
 0x568   :  { %v421_v18 = vpop.f32.mrf.mxu2 }
 0x569   :  { %v424_v19 = vadd.f32 %v421_v18, %v396_v17 }
 0x5c3   :  { %v453_v20 = vpop.f32.mrf.mxu3 }
 0x5c4   :  { %v456_v21 = vadd.f32 %v453_v20, %v424_v19 }
 0x5d5   :  { %v485_v22 = vpop.f32.mrf.mxu0 }
 0x5d6   :  { %v488_v23 = vadd.f32 %v485_v22, %v456_v21 }
 0x5d8   :  { %v489_v24 = vmul.f32 0.1, %v488_v23 }
 0x5da   :  { %v490_v25 = vmax.f32 %v488_v23, %v489_v24 }
 0x5dc   :  { %552 = vrot.lane.b32.xlu2 %v490_v25, %s1206_s28  ;;  %520 = vrot.lane.b32.xlu1 %v490_v25, %s1205_s14 }
 0x5dd   :  { %1149 = vmatpush.msk.msrb.mxu1 %vm146_vm4, %v490_v25  ;;  %v605_v44 = vpop.f32.mrf.mxu0 }
 0x5de   :  { %1150 = vmatmul.msk.f32.vlgmr.msrb.gmra.mxu1 %vm142_vm5, %v492_v26 }
 0x5df   :  { %1157 = vmatpush.msk.msra.mxu1 %vm146_vm4, %v1322_v43 }
 0x5e6   :  { %1158 = vmatmul.msk.f32.vlgmr.msra.gmra.mxu1 %vm142_vm5, %v609_v31 }
 0x636   :  { %v553_v27 = vpop.permute.xlu2 %552 }
 0x637   :  { %v555_v29 = vsel %vm51_vm1, %v553_v27, 0.0 }
 0x638   :  { %1153 = vmatpush.msk.msra.mxu3 %vm146_vm4, %v555_v29 }
 0x639   :  { %1154 = vmatmul.msk.f32.vlgmr.msra.gmra.mxu3 %vm142_vm5, %v556_v28 }
 0x64e   :  { %v521_v33 = vpop.permute.xlu1 %520 }
 0x64f   :  { %v523_v35 = vsel %vm51_vm1, 0.0, %v521_v33 }
 0x650   :  { %1151 = vmatpush.msk.msra.mxu2 %vm146_vm4, %v523_v35 }
 0x651   :  { %1152 = vmatmul.msk.f32.vlgmr.msra.gmra.mxu2 %vm142_vm5, %v524_v34 }
 0x652   :  { %1159 = vmatpush.msk.msrb.mxu2 %vm146_vm4, %v637_v36 }
 0x654   :  { %801 = vmatpush.msra.mxu2 %v1269_v13 }
 0x659   :  { %1160 = vmatmul.msk.f32.vlgmr.msrb.gmra.mxu2 %vm142_vm5, %v638_v37 }
 0x65b   :  { %v516_v39 = vpop.f32.mrf.mxu1 }
 0x65c   :  { %v519_v40 = vadd.f32 %v516_v39, %v491_v38  ;;  %v887_v39 = vld [vmem:[%s1567_s1 + $0x1b0] sm:$0xff] }
 0x661   :  { %1170 = vmatmul.msk.f32.vlgmr.msra.gmra.mxu2 %vm83_vm3, %v778_v53 }
 0x663   :  { %v630_v46 = vpop.f32.mrf.mxu1 }
 0x669   :  { %1171 = vmatmul.msk.f32.gmra.mxu2 %vm83_vm3, %v779_v55 }
 0x6bc   :  { %v580_v42 = vpop.f32.mrf.mxu3 }
 0x6d4   :  { %v548_v41 = vpop.f32.mrf.mxu2 }
 0x6d5   :  { %v551_v43 = vadd.f32 %v548_v41, %v519_v40  ;;  %v1005_v40 = vld [vmem:[%s1567_s1 + $0x1e8] sm:$0xff]  ;;  %v1038_v41 = vld [vmem:[%s1567_s1 + $0x1f8] sm:$0xff] }
 0x6d7   :  { %v583_v45 = vadd.f32 %v580_v42, %v551_v43 }
 0x6d9   :  { %v608_v47 = vadd.f32 %v605_v44, %v583_v45  ;;  %v930_v44 = vld [vmem:[%s1567_s1 + $0x1c0] sm:$0xff] }
 0x6db   :  { %v633_v13 = vadd.f32 %v630_v46, %v608_v47  ;;  %v971_v46 = vld [vmem:[%s1567_s1 + $0x1d0] sm:$0xff] }
 0x6dc   :  { %v662_v48 = vpop.f32.mrf.mxu2 }
 0x6dd   :  { %v665_v49 = vadd.f32 %v662_v48, %v633_v13  ;;  %v931_v48 = vld [vmem:[%s1567_s1 + $0x1c8] sm:$0xff] }
 0x6df   :  { %v666_v50 = vmul.f32 0.1, %v665_v49 }
 0x6e1   :  { %v667_v51 = vmax.f32 %v665_v49, %v666_v50  ;;  %v1078_v49 = vld [vmem:[%s1567_s1 + $0x200] sm:$0xff]  ;;  %v1079_v50 = vld [vmem:[%s1567_s1 + $0x208] sm:$0xff] }
 0x6e3   :  { %741 = vrot.lane.b32.xlu2 %v667_v51, %s1206_s28  ;;  %704 = vrot.lane.b32.xlu1 %v667_v51, %s1205_s14 }
 0x6e4   :  { %693 = vmatpush.msrb.mxu3 %v667_v51  ;;  %v803_v17 = vpop.f32.mrf.mxu2 }
 0x6e5   :  { %1161 = vmatmul.msk.f32.vlgmr.msrb.gmra.mxu3 %vm83_vm3, %v670_v52  ;;  %v885_v52 = vld [vmem:[%s1568_s2 + $0x80] sm:$0xff] }
 0x6e6   :  { %1173 = vmatpush.msk.msra.mxu3 %vm1248_vm2, %v1281_v16  ;;  %v811_v16 = vld [vmem:[%s1567_s1 + $0x190] sm:$0xff] }
 0x6ec   :  { %v806_v27 = vpop.f32.mrf.mxu2 }
 0x6ed   :  { %1162 = vmatmul.msk.f32.gmra.mxu3 %vm83_vm3, %v671_v54 }
 0x6f5   :  { %1174 = vmatmul.msk.f32.vlgmr.msra.gmra.mxu3 %vm83_vm3, %v811_v16 }
 0x6fd   :  { %1175 = vmatmul.msk.f32.gmra.mxu3 %vm83_vm3, %v812_v58 }
 0x73d   :  { %v742_v57 = vpop.permute.xlu2 %741 }
 0x73e   :  { %1167 = vmatpush.msk.msrb.mxu1 %vm51_vm1, %v742_v57 }
 0x73f   :  { %1168 = vmatmul.msk.f32.vlgmr.msrb.gmra.mxu1 %vm83_vm3, %v745_v56  ;;  %v886_v56 = vld [vmem:[%s1568_s2 + $0x88] sm:$0xff] }
 0x747   :  { %1169 = vmatmul.msk.f32.gmra.mxu1 %vm83_vm3, %v746_v59 }
 0x755   :  { %v705_v61 = vpop.permute.xlu1 %704 }
 0x756   :  { %1164 = vmatpush.msk.msrb.mxu0 %vm1248_vm2, %v705_v61 }
 0x757   :  { %1165 = vmatmul.msk.f32.vlgmr.msrb.gmra.mxu0 %vm83_vm3, %v708_v60 }
 0x758   :  { %1176 = vmatpush.msk.msra.mxu0 %vm51_vm1, %v845_v62 }
 0x75a   :  { %1026 = vmatpush.msrb.mxu0 %v1230_v0 }
 0x75c   :  { %1027 = vmatpush.msrb.mxu0 %v1238_v1 }
 0x75f   :  { %1166 = vmatmul.msk.f32.gmra.mxu0 %vm83_vm3, %v709_v63 }
 0x767   :  { %1177 = vmatmul.msk.f32.vlgmr.msra.gmra.mxu0 %vm83_vm3, %v848_v2 }
 0x768   :  { %v695_v7 = vpop.f32.mrf.mxu3 }
 0x769   :  { %v701_v9 = vadd.f32 %v695_v7, %v668_v8 }
 0x76f   :  { %1178 = vmatmul.msk.f32.gmra.mxu0 %vm83_vm3, %v849_v5 }
 0x770   :  { %v698_v10 = vpop.f32.mrf.mxu3 }
 0x771   :  { %v702_v18 = vadd.f32 %v698_v10, %v669_v15 }
 0x778   :  { %v836_v21 = vpop.f32.mrf.mxu3 }
 0x780   :  { %v839_v32 = vpop.f32.mrf.mxu3 }
 0x7bc   :  { %v770_v12 = vpop.f32.mrf.mxu1 }
 0x7c4   :  { %v773_v24 = vpop.f32.mrf.mxu1 }
 0x7d4   :  { %v733_v11 = vpop.f32.mrf.mxu0 }
 0x7d5   :  { %v739_v14 = vadd.f32 %v733_v11, %v701_v9 }
 0x7d7   :  { %v776_v19 = vadd.f32 %v770_v12, %v739_v14 }
 0x7d9   :  { %v809_v22 = vadd.f32 %v803_v17, %v776_v19 }
 0x7db   :  { %v842_v25 = vadd.f32 %v836_v21, %v809_v22 }
 0x7dc   :  { %v736_v20 = vpop.f32.mrf.mxu0 }
 0x7dd   :  { %v740_v23 = vadd.f32 %v736_v20, %v702_v18 }
 0x7df   :  { %v777_v26 = vadd.f32 %v773_v24, %v740_v23 }
 0x7e1   :  { %v810_v30 = vadd.f32 %v806_v27, %v777_v26 }
 0x7e3   :  { %v843_v34 = vadd.f32 %v839_v32, %v810_v30 }
 0x7e4   :  { %v873_v28 = vpop.f32.mrf.mxu0 }
 0x7e5   :  { %v879_v29 = vadd.f32 %v873_v28, %v842_v25 }
 0x7e7   :  { %v881_v31 = vmul.f32 0.1, %v879_v29 }
 0x7e9   :  { %v883_v33 = vmax.f32 %v879_v29, %v881_v31 }
 0x7eb   :  { %922 = vrot.lane.b32.xlu2 %v883_v33, %s1205_s14 }
 0x7ec   :  { %v876_v35 = vpop.f32.mrf.mxu0 }
 0x7ed   :  { %v880_v36 = vadd.f32 %v876_v35, %v843_v34 }
 0x7ef   :  { %v882_v37 = vmul.f32 0.1, %v880_v36 }
 0x7f1   :  { %v884_v38 = vmax.f32 %v880_v36, %v882_v37 }
 0x7f3   :  { %965 = vrot.lane.b32.xlu0 %v884_v38, %s1206_s28  ;;  %924 = vrot.lane.b32.xlu1 %v884_v38, %s1205_s14 }
 0x7f4   :  { %909 = vmatpush.msra.mxu1 %v884_v38  ;;  %1072 = vrot.lane.b32.xlu2 %v1230_v0, %s1206_s28  ;;  %v888_v0 = vld [vmem:[%s1567_s1 + $0x1b8] sm:$0xff] }
 0x7f6   :  { %910 = vmatpush.msra.mxu1 %v883_v33 }
 0x7f7   :  { %1179 = vmatmul.msk.f32.vlgmr.msra.gmra.mxu1 %vm18_vm0, %v887_v39 }
 0x7f8   :  { %1194 = vmatpush.msk.msrb.mxu1 %vm1248_vm2, %v1252_v4  ;;  %v1004_v4 = vld [vmem:[%s1567_s1 + $0x1e0] sm:$0xff] }
 0x7f9   :  { %1191 = vmatmul.msk.f32.vlgmr.msrb.gmra.mxu0 %vm18_vm0, %v1004_v4 }
 0x7fa   :  { %1196 = vmatpush.msk.msrb.mxu1 %vm1248_vm2, %v1260_v6 }
 0x7fb   :  { %963 = vrot.lane.b32.xlu1 %v883_v33, %s1206_s28  ;;  %1070 = vrot.lane.b32.xlu0 %v1238_v1, %s1206_s28  ;;  %v1037_v1 = vld [vmem:[%s1567_s1 + $0x1f0] sm:$0xff] }
 0x7ff   :  { %1180 = vmatmul.msk.f32.gmra.mxu1 %vm18_vm0, %v888_v0 }
 0x801   :  { %1192 = vmatmul.msk.f32.gmra.mxu0 %vm18_vm0, %v1005_v40 }
 0x807   :  { %1197 = vmatmul.msk.f32.vlgmr.msrb.gmra.mxu1 %vm18_vm0, %v1037_v1 }
 0x80f   :  { %1198 = vmatmul.msk.f32.gmra.mxu1 %vm18_vm0, %v1038_v41 }
 0x845   :  { %v923_v6 = vpop.permute.xlu2 %922 }
 0x84e   :  { %v1073_v45 = vpop.permute.xlu2 %1072 }
 0x865   :  { %v966_v42 = vpop.permute.xlu0 %965  ;;  %v925_v43 = vpop.permute.xlu1 %924 }
 0x866   :  { %1182 = vmatpush.msk.msrb.mxu2 %vm1248_vm2, %v925_v43  ;;  %1187 = vmatpush.msk.msrb.mxu3 %vm51_vm1, %v966_v42 }
 0x868   :  { %1184 = vmatpush.msk.msrb.mxu2 %vm1248_vm2, %v923_v6 }
 0x869   :  { %1185 = vmatmul.msk.f32.vlgmr.msrb.gmra.mxu2 %vm18_vm0, %v930_v44 }
 0x86a   :  { %1199 = vmatpush.msk.msra.mxu2 %vm51_vm1, %v1073_v45 }
 0x86d   :  { %v964_v47 = vpop.permute.xlu1 %963  ;;  %v1071_v13 = vpop.permute.xlu0 %1070 }
 0x86e   :  { %1188 = vmatpush.msk.msrb.mxu3 %vm51_vm1, %v964_v47  ;;  %1200 = vmatpush.msk.msra.mxu2 %vm51_vm1, %v1071_v13 }
 0x86f   :  { %1189 = vmatmul.msk.f32.vlgmr.msrb.gmra.mxu3 %vm18_vm0, %v971_v46 }
 0x871   :  { %1186 = vmatmul.msk.f32.gmra.mxu2 %vm18_vm0, %v931_v48 }
 0x874   :  { %v912_v51 = vpop.f32.mrf.mxu1 }
 0x875   :  { %v918_v16 = vadd.f32 %v912_v51, %v885_v52 }
 0x876   :  { %v1029_v58 = vpop.f32.mrf.mxu0 }
 0x877   :  { %1190 = vmatmul.msk.f32.gmra.mxu3 %vm18_vm0, %v972_v3 }
 0x879   :  { %1201 = vmatmul.msk.f32.vlgmr.msra.gmra.mxu2 %vm18_vm0, %v1078_v49 }
 0x87c   :  { %v915_v54 = vpop.f32.mrf.mxu1 }
 0x87d   :  { %v919_v61 = vadd.f32 %v915_v54, %v886_v56 }
 0x87e   :  { %v1032_v10 = vpop.f32.mrf.mxu0 }
 0x881   :  { %1202 = vmatmul.msk.f32.gmra.mxu2 %vm18_vm0, %v1079_v50 }
 0x884   :  { %v1062_v62 = vpop.f32.mrf.mxu1 }
 0x88c   :  { %v1065_v14 = vpop.f32.mrf.mxu1 }
 0x8ec   :  { %v955_v53 = vpop.f32.mrf.mxu2 }
 0x8ed   :  { %v961_v55 = vadd.f32 %v955_v53, %v918_v16 }
 0x8f2   :  { %v996_v57 = vpop.f32.mrf.mxu3 }
 0x8f3   :  { %v1002_v59 = vadd.f32 %v996_v57, %v961_v55 }
 0x8f4   :  { %v958_v60 = vpop.f32.mrf.mxu2 }
 0x8f5   :  { %v1035_v63 = vadd.f32 %v1029_v58, %v1002_v59  ;;  %v962_v2 = vadd.f32 %v958_v60, %v919_v61 }
 0x8f7   :  { %v1068_v7 = vadd.f32 %v1062_v62, %v1035_v63 }
 0x8fa   :  { %v999_v5 = vpop.f32.mrf.mxu3 }
 0x8fb   :  { %v1003_v8 = vadd.f32 %v999_v5, %v962_v2 }
 0x8fc   :  { %v1103_v9 = vpop.f32.mrf.mxu2 }
 0x8fd   :  { %v1109_v11 = vadd.f32 %v1103_v9, %v1068_v7  ;;  %v1036_v12 = vadd.f32 %v1032_v10, %v1003_v8 }
 0x8ff   :  { %1111 = vst.msk [vmem:[%s1569_s3] sm:$0xff] %vm142_vm5, %v1109_v11  ;;  %v1069_v15 = vadd.f32 %v1065_v14, %v1036_v12 }
 0x904   :  { %v1106_v17 = vpop.f32.mrf.mxu2 }
 0x905   :  { %v1110_v18 = vadd.f32 %v1106_v17, %v1069_v15 }
 0x907   :  { %1112 = vst.msk [vmem:[%s1569_s3 + $0x8] sm:$0xff] %vm142_vm5, %v1110_v18 }

</bundles_post_ra>
